<compile_context>
chip_gen: v7x
topology: tpu7x:2x2x1
jax: 0.10.0
libtpu: 0.0.40
codegen_flags: <defaults>
</compile_context>

<pallas_src>
import jax
import jax.numpy as jnp
from jax.experimental import pallas as pl
from jax.experimental.pallas import tpu as pltpu


TILE_M = 512          # rows per output tile (large-M path)
TILE_N = 896          # Cout chunk (multiple of 128; 2688 / 896 = 3 chunks)
LANE = 128


def _pick_tile_n(cout):
    """Largest preferred lane-aligned Cout tile that divides Cout exactly."""
    if cout % LANE != 0:
        return cout                      # full extent is always legal
    for cand in (TILE_N, 512, 384, 256, LANE):
        if cand <= cout and cout % cand == 0:
            return cand
    return cout


def _conv1x1_kernel(x_ref, w_ref, b_ref, o_ref):
    # x_ref: (tile_m, Cin)   w_ref: (Cin, tile_n)   b_ref: (1, tile_n) f32
    w = w_ref[...].astype(jnp.float32)   # no-op for f32 weights; cheap VPU cast for bf16
    acc = jnp.dot(x_ref[...], w, preferred_element_type=jnp.float32)
    o_ref[...] = (acc + b_ref[...]).astype(o_ref.dtype)


def prepare_params(weight, bias, weight_dtype=jnp.bfloat16):
    """One-time param prep: (Cout, Cin, 1, 1) -> (Cin, Cout) in weight_dtype."""
    Cout, Cin = weight.shape[0], weight.shape[1]
    w2d = weight.reshape(Cout, Cin).T.astype(weight_dtype)   # (Cin, Cout)
    b2d = bias.reshape(1, Cout).astype(jnp.float32)
    return w2d, b2d


def conv2d_1x1(x_nchw, w2d, b2d):
    """1x1 conv, stride 1.

    x_nchw: (N, Cin, H, W) float32
    w2d:    (Cin, Cout)    float32 or bfloat16 (from prepare_params)
    b2d:    (1, Cout)      float32
    returns (N, Cout, H, W) in x dtype
    """
    N, Cin, H, W = x_nchw.shape
    Cin_w, Cout = w2d.shape
    assert Cin_w == Cin
    M = N * H * W

    # For the spec shape (H = W = 1) this is a pure reshape (no HBM transpose).
    if H == 1 and W == 1:
        x2d = x_nchw.reshape(N, Cin)
    else:
        # TODO(synk): for large spatial inputs, flip the matmul orientation to
        # keep NCHW on both sides and avoid these two transpose passes.
        x2d = jnp.transpose(x_nchw, (0, 2, 3, 1)).reshape(M, Cin)

    tile_m = min(TILE_M, M)              # full-extent block when M is small
    tile_n = _pick_tile_n(Cout)
    grid = (pl.cdiv(Cout, tile_n), pl.cdiv(M, tile_m))   # (j: Cout chunks, i: M tiles)

    out2d = pl.pallas_call(
        _conv1x1_kernel,
        out_shape=jax.ShapeDtypeStruct((M, Cout), x_nchw.dtype),
        grid_spec=pltpu.PrefetchScalarGridSpec(
            num_scalar_prefetch=0,
            grid=grid,
            in_specs=[
                # x: full (unpadded) Cin as last dim; streamed over the inner M axis.
                pl.BlockSpec((tile_m, Cin), lambda j, i: (i, 0)),
                # weight chunk: constant over the inner M axis => fetched once per j.
                pl.BlockSpec((Cin, tile_n), lambda j, i: (0, j)),
                pl.BlockSpec((1, tile_n), lambda j, i: (0, j)),
            ],
            out_specs=pl.BlockSpec((tile_m, tile_n), lambda j, i: (i, j)),
        ),
        compiler_params=pltpu.CompilerParams(
            dimension_semantics=("parallel", "parallel"),   # no reduction axis
            vmem_limit_bytes=48 * 1024 * 1024,
        ),
    )(x2d, w2d, b2d)

    if H == 1 and W == 1:
        return out2d.reshape(N, Cout, 1, 1)
    return out2d.reshape(N, H, W, Cout).transpose(0, 3, 1, 2)


if __name__ == "__main__":
    key = jax.random.PRNGKey(0)
    kx, kw, kb = jax.random.split(key, 3)

    # Shapes from the PyTorch module: Conv2d(112, 2688, 1x1), x = (1,112,1,1).
    N, Cin, H, W = 1, 112, 1, 1
    Cout = 2688

    x = jax.random.normal(kx, (N, Cin, H, W), dtype=jnp.float32)
    weight = jax.random.normal(kw, (Cout, Cin, 1, 1), dtype=jnp.float32) * 0.05
    bias = jax.random.normal(kb, (Cout,), dtype=jnp.float32) * 0.05

    # Plain-JAX reference (matches the PyTorch module's forward).
    ref = (
        jnp.einsum("nchw,oc->nohw", x, weight.reshape(Cout, Cin))
        + bias.reshape(1, Cout, 1, 1)
    )

    # 1) Exact-parity path: f32 weights.
    w32, b32 = prepare_params(weight, bias, weight_dtype=jnp.float32)
    out32 = conv2d_1x1(x, w32, b32)
    jax.block_until_ready(out32)
    assert out32.shape == (N, Cout, H, W)
    assert jnp.allclose(out32, ref, atol=1e-4, rtol=1e-4)

    # 2) Memory-optimized path: bf16 weights (f32 accumulation), ~2x less HBM
    #    weight traffic on this weight-streaming GEMV.
    wbf, bbf = prepare_params(weight, bias, weight_dtype=jnp.bfloat16)
    outbf = conv2d_1x1(x, wbf, bbf)
    jax.block_until_ready(outbf)
    assert outbf.shape == (N, Cout, H, W)
    assert jnp.allclose(outbf, ref, atol=5e-2, rtol=5e-2)

    print("KERNEL_OK")
</pallas_src>

<mosaic_0001>
module attributes {stable_mosaic.version = 11 : i64} {
  func.func @_conv1x1_kernel(%arg0: i32, %arg1: i32, %arg2: memref<1x112xf32, #tpu.memory_space<vmem>>, %arg3: memref<112x896xf32, #tpu.memory_space<vmem>>, %arg4: memref<1x896xf32, #tpu.memory_space<vmem>>, %arg5: memref<1x896xf32, #tpu.memory_space<vmem>>) attributes {dimension_semantics = [#tpu.dimension_semantics<parallel>, #tpu.dimension_semantics<parallel>], iteration_bounds = array<i64: 3, 1>, scalar_prefetch = 0 : i64, scratch_operands = 0 : i64, tpu.core_type = #tpu.core_type<tc>, window_params = [{transform_indices = @transform_0, window_bounds = array<i64: 1, 112>}, {transform_indices = @transform_1, window_bounds = array<i64: 112, 896>}, {transform_indices = @transform_2, window_bounds = array<i64: 1, 896>}, {transform_indices = @transform_3, window_bounds = array<i64: 1, 896>}]} {
    %c0 = arith.constant 0 : index
    %c0_0 = arith.constant 0 : index
    %0 = vector.load %arg3[%c0, %c0_0] : memref<112x896xf32, #tpu.memory_space<vmem>>, vector<112x896xf32>
    %c0_1 = arith.constant 0 : index
    %c0_2 = arith.constant 0 : index
    %1 = vector.load %arg2[%c0_1, %c0_2] : memref<1x112xf32, #tpu.memory_space<vmem>>, vector<1x112xf32>
    %cst = arith.constant dense<0.000000e+00> : vector<1x896xf32>
    %2 = tpu.matmul %1, %0, %cst {dimension_numbers = #tpu.dot_dimension_numbers<[1], [0], [0], [1], [0, 0, 1, 1], [], []>} : vector<1x112xf32>, vector<112x896xf32>, vector<1x896xf32> -> vector<1x896xf32>
    %c0_3 = arith.constant 0 : index
    %c0_4 = arith.constant 0 : index
    %3 = vector.load %arg4[%c0_3, %c0_4] : memref<1x896xf32, #tpu.memory_space<vmem>>, vector<1x896xf32>
    %4 = arith.addf %2, %3 : vector<1x896xf32>
    %c0_5 = arith.constant 0 : index
    %c0_6 = arith.constant 0 : index
    %5 = vector.load %arg5[%c0_5, %c0_6] : memref<1x896xf32, #tpu.memory_space<vmem>>, vector<1x896xf32>
    tpu.vector_store %arg5[%c0_5, %c0_6], %4 {strides = array<i32>} : memref<1x896xf32, #tpu.memory_space<vmem>>, vector<1x896xf32>,
    return
  }
  func.func @transform_0(%arg0: i32, %arg1: i32) -> (i32, i32) {
    %c0_i32 = arith.constant 0 : i32
    %c0_i32_0 = arith.constant 0 : i32
    return %arg1, %c0_i32 : i32, i32
  }
  func.func @transform_1(%arg0: i32, %arg1: i32) -> (i32, i32) {
    %c0_i32 = arith.constant 0 : i32
    %c0_i32_0 = arith.constant 0 : i32
    return %c0_i32, %arg0 : i32, i32
  }
  func.func @transform_2(%arg0: i32, %arg1: i32) -> (i32, i32) {
    %c0_i32 = arith.constant 0 : i32
    %c0_i32_0 = arith.constant 0 : i32
    return %c0_i32, %arg0 : i32, i32
  }
  func.func @transform_3(%arg0: i32, %arg1: i32) -> (i32, i32) {
    %c0_i32 = arith.constant 0 : i32
    return %arg1, %arg0 : i32, i32
  }
}

</mosaic_0001>

<bundles_post_ra>
// kernel: tpu_custom_call.1
= control target key start
LH: loop header
LB: loop body
LE: loop exit
PB: predicated region body
PF: predicated region fallthrough
CT: control target
= control target key end

     0   :  { %s1715_s0 = inlined_call_operand.hbm [shape: f32[1,112], index: 0, kind: input, shape index: {}]   ;;  %s1716_s1 = inlined_call_operand.hbm [shape: f32[112,2688], index: 1, kind: input, shape index: {}]   ;;  %s1717_s2 = inlined_call_operand.hbm [shape: f32[1,2688], index: 2, kind: input, shape index: {}]   ;;  %s1718_s3 = inlined_call_operand.hbm [shape: f32[1,2688], index: 3, kind: output, shape index: {}]  }
   0x1   :  { %1727 = sst [smem:[#allocation13_spill]] %s1716_s1 }
   0x2   :  { %8 = vsyncpa [#allocation3], 0 }
   0x3   :  { %9 = vsyncpa [#allocation6], 0 }
   0x4   :  { %11 = vsyncpa [#allocation6 + $0x1], 0 }
   0x5   :  { %12 = vsyncpa [#allocation4], 0 }
   0x6   :  { %14 = vsyncpa [#allocation4 + $0x1], 0  ;;  %s1343_s12 = smov 0   ;;  %s1345_s13 = smov 0  }
   0x7   :  { %s1347_s14 = smov 0   ;;  %s1349_s15 = smov 0  }
   0x8   :  { %s1351_s16 = smov 0   ;;  %s1353_s17 = smov 0  }
   0x9 LB: > { %s32_s18 = sadd.s32 1, %s1306_s16  ;;  %s65_s19 = sadd.s32 1, %s1298_s14  ;;  %s1310_s17 = sphi %s1353_s17, %s20_s17   ;;  %s1306_s16 = sphi %s1351_s16, %s1750_s16   ;;  %s1302_s15 = sphi %s1349_s15, %s1749_s15   ;;  %s1298_s14 = sphi %s1347_s14, %s1748_s14   ;;  %s1294_s13 = sphi %s1345_s13, %s1747_s13   ;;  %s1290_s12 = sphi %s1343_s12, %s1746_s12  }
   0xa   : > { %p34_p0 = scmp.ge.s32.totalorder %s32_s18, 3  ;;  %p72_p1 = scmp.ne.s32.totalorder %s1298_s14, %s1294_s13 }
   0xb   : > { %p73_p2 = scmp.eq.s32.totalorder %s1310_s17, 0  ;;  %p1077_p4 = scmp.lt.s32.totalorder %s1310_s17, 3 }
   0xc   : > { %s1752_s18 = smov (%p34_p0, %s32_s18), 0  ;;  %s169_s21 = sand.u32 1, %s1310_s17  }
   0xd   : > { %1728 = sst [smem:[#allocation12_spill]] %s1752_s18  ;;  %p74_p3 = por %p73_p2, %p72_p1 }
   0xe   : > { %s62_s20 = ssub.s32 %s1306_s16, %s1752_s18  ;;  %s171_s22 = sand.u32 1, %s1298_s14  }
   0xf   : > { %p63_p5 = scmp.eq.s32.totalorder %s62_s20, 0  ;;  %s893_s23 = smul.u32 896, %s1306_s16 }
  0x10   : > { %s1047_s25 = smul.u32 784, %s171_s22  ;;  %s1729_s1 = sld [smem:[#allocation13_spill]] }
  0x11   : > { %s1390_s24 = scalar_select %p63_p5, %s1298_s14, %s65_s19  }
  0x12   : > { %p1399_p6 = pnand %p1077_p4, %p74_p3  ;;  %s173_s30 = scalar_lea.vmem [#allocation5], %s1047_s25 }
  0x13   : > { %s180_s4 = sshll.u32 %s173_s30, 4  ;;  %s1405_s5 = scalar_lea.sflag [#allocation6], %s169_s21  ;;  %s1403_s4 = int_to_ptr.vmem [resolvable:$true] %s180_s4 }
  0x14   : > { %s1730_s29 = scalar_select %p1399_p6, 1, 0 }
  0x15   : > { %p1721_p8 = pneg %p1399_p6 }
  0x16   : > { %s1397_s28 = scalar_lea.hbm %s1729_s1, %s893_s23  ;;  %s1141_s9 = scalar_lea.hbm %s1729_s1, 37632 }
  0x17   : > { %s1136_s6 = scalar_lea.hbm %s1397_s28, 12544  ;;  %p1142_p11 = scmp.lt.u32.totalorder %s1397_s28, %s1729_s1 }
  0x18   : > { %p1137_p7 = scmp.ne.s32.totalorder %s1397_s28, %s1136_s6  ;;  %p1143_p12 = scmp.lt.u32.totalorder %s1141_s9, %s1136_s6 }
  0x19   : > { %p1145_p0 = scmp.lt.u32.totalorder %s1136_s6, %s1397_s28 }
  0x1a   : > { %p1139_p9 = pnand %p1721_p8, %p1137_p7  ;;  %p1144_p13 = por %p1143_p12, %p1142_p11 }
  0x1c   : > { %p1140_p10 = pneg %p1139_p9  ;;  %p1146_p2 = por %p1145_p0, %p1144_p13 }
  0x1e   : > { %p1147_p3 = pnand %p1146_p2, %p1140_p10 }
  0x20   : > { %1150 = shalt.err (!%p1147_p3)
}
  0x21   : > { %s1151_s19 = scalar_lea.vmem %s1403_s4, 12544  ;;  %s1312_s20 = smov [#allocation5]  }
  0x22   : > { %p1152_p4 = scmp.ne.s32.totalorder %s1403_s4, %s1151_s19  ;;  %s1156_s21 = sshll.u32 %s1312_s20, 4  ;;  %s1157_s21 = int_to_ptr.vmem [resolvable:$false] %s1156_s21 }
  0x23   : > { %s1158_s23 = scalar_lea.vmem %s1157_s21, 25088  ;;  %p1159_p9 = scmp.lt.s32.totalorder %s1403_s4, %s1157_s21 }
  0x24   : > { %p1154_p5 = pnand %p1152_p4, %p1721_p8  ;;  %p1160_p11 = scmp.lt.s32.totalorder %s1158_s23, %s1151_s19 }
  0x26   : > { %p1155_p7 = pneg %p1154_p5  ;;  %p1161_p12 = por %p1160_p11, %p1159_p9 }
  0x28   : > { %p1162_p13 = pnand %p1161_p12, %p1155_p7 }
  0x2a   : > { %1165 = shalt.err (!%p1162_p13)
}
  0x2b   : > { %s1313_s25 = smov 2688   ;;  %s1314_s26 = smov 896  }
  0x2c   : > { %s1315_s27 = smov 56   ;;  %s1434_s30 = sadd.s32 4294967295, %s1310_s17  }
  0x2d   : > { %1068 = dma.hbm_to_vmem [thread:$0]  (!%p1399_p6), %s1397_s28, 12544, %s1403_s4, %s1405_s5, %s1313_s25, %s1314_s26, %s1315_s27  }
  0x2e   : > { %s878_s6 = sadd.s32 4294967294, %s1310_s17   ;;  %p78_p10 = scmp.ne.s32.totalorder %s1294_s13, %s1290_s12 }
  0x2f   : > { %p1720_p0 = scmp.eq.s32.totalorder %s1434_s30, 0  ;;  %p130_p2 = scmp.eq.s32.totalorder %s1434_s30, 2 }
  0x30   : > { %p136_p3 = scmp.eq.s32.totalorder %s878_s6, 2  ;;  %p879_p5 = scmp.ge.s32.totalorder %s1310_s17, 1 }
  0x31   : > { %p1443_p4 = por %p1720_p0, %p78_p10  ;;  %p1451_p7 = por %p130_p2, %p72_p1 }
  0x32   : > { %p1455_p9 = por %p136_p3, %p78_p10  ;;  %p143_p11 = scmp.lt.s32.totalorder %s1310_s17, 4 }
  0x33   : > { %s1731_s7 = scalar_select %p1443_p4, 1, 0 }
  0x34   : > { %s1732_s28 = scalar_select %p1451_p7, 1, 0 }
  0x35   : > { %s1733_s4 = scalar_select %p1455_p9, 1, 0 }
  0x36   : > { %s1048_s8 = smul.u32 7, %s171_s22  ;;  %p1462_p12 = pnand %p879_p5, %p143_p11 }
  0x37   : > { %s1316_s10 = smov [#allocation2]   ;;  %s894_s19 = smul.u32 112, %s1306_s16 }
  0x38   : > { %s1734_s9 = scalar_select %p1462_p12, 1, 0 }
  0x39   : > { %s158_s11 = sshll.u32 %s1316_s10, 4  ;;  %p1061_p13 = pneg %p1462_p12  ;;  %s159_s11 = int_to_ptr.vmem [resolvable:$true] %s158_s11 }
  0x3a   : > { %s194_s20 = scalar_lea.vmem [#allocation7], %s1048_s8  ;;  %s1478_s26 = scalar_lea.hbm %s1717_s2, %s894_s19 }
  0x3b   : > { %s202_s21 = sshll.u32 %s194_s20, 4  ;;  %p1471_p1 = pnand %p1061_p13, %p1720_p0  ;;  %s1480_s21 = int_to_ptr.vmem [resolvable:$true] %s202_s21 }
  0x3c   : > { %s1166_s10 = scalar_lea.hbm %s1715_s0, 16 }
  0x3d   : > { %p1167_p10 = scmp.ne.s32.totalorder %s1715_s0, %s1166_s10  ;;  %p1168_p2 = pneg %p1471_p1 }
  0x3e   : > { %p1173_p11 = scmp.lt.u32.totalorder %s1166_s10, %s1715_s0 }
  0x3f   : > { %p1169_p3 = pnand %p1168_p2, %p1167_p10 }
  0x41   : > { %p1170_p5 = pneg %p1169_p3 }
  0x43   : > { %p1175_p13 = pnand %p1173_p11, %p1170_p5 }
  0x45   : > { %1178 = shalt.err (!%p1175_p13)
}
  0x46   : > { %s1179_s19 = scalar_lea.vmem %s159_s11, 16  ;;  %s1186_s25 = scalar_lea.vmem %s159_s11, 32 }
  0x47   : > { %p1180_p0 = scmp.ne.s32.totalorder %s159_s11, %s1179_s19  ;;  %p1187_p7 = scmp.lt.s32.totalorder %s159_s11, %s159_s11 }
  0x48   : > { %p1188_p4 = scmp.lt.s32.totalorder %s1186_s25, %s1179_s19 }
  0x49   : > { %p1182_p8 = pnand %p1180_p0, %p1168_p2 }
  0x4a   : > { %p1189_p12 = por %p1188_p4, %p1187_p7 }
  0x4b   : > { %p1183_p9 = pneg %p1182_p8 }
  0x4d   : > { %p1190_p6 = pnand %p1189_p12, %p1183_p9 }
  0x4f   : > { %1193 = shalt.err (!%p1190_p6)
}
  0x50   : > { %1064 = dma.hbm_to_vmem [thread:$0]  (!%p1471_p1), %s1715_s0, 16, %s159_s11, [#allocation3]  }
  0x51   : > { %s1194_s1 = scalar_lea.hbm %s1478_s26, 112  ;;  %p1736_p8 = scmp.ne.s32.totalorder %s1730_s29, 0 }
  0x52   : > { %p1195_p0 = scmp.ne.s32.totalorder %s1478_s26, %s1194_s1  ;;  %s1199_s10 = scalar_lea.hbm %s1717_s2, 336 }
  0x53   : > { %p1737_p10 = pneg %p1736_p8  ;;  %p1200_p6 = scmp.lt.u32.totalorder %s1478_s26, %s1717_s2 }
  0x54   : > { %p1201_p4 = scmp.lt.u32.totalorder %s1199_s10, %s1194_s1  ;;  %p1203_p9 = scmp.lt.u32.totalorder %s1194_s1, %s1478_s26 }
  0x55   : > { %p1197_p2 = pnand %p1195_p0, %p1737_p10 }
  0x56   : > { %p1202_p7 = por %p1201_p4, %p1200_p6 }
  0x57   : > { %p1198_p3 = pneg %p1197_p2 }
  0x58   : > { %p1204_p12 = por %p1203_p9, %p1202_p7 }
  0x5a   : > { %p1205_p5 = pnand %p1204_p12, %p1198_p3 }
  0x5c   : > { %1208 = shalt.err (!%p1205_p5)
}
  0x5d   : > { %s1209_s11 = scalar_lea.vmem %s1480_s21, 112  ;;  %p1738_p11 = pmov %p1737_p10 }
  0x5e   : > { %p1210_p1 = scmp.ne.s32.totalorder %s1480_s21, %s1209_s11  ;;  %s1317_s20 = smov [#allocation7]  }
  0x5f   : > { %s1214_s19 = sshll.u32 %s1317_s20, 4  ;;  %s1215_s19 = int_to_ptr.vmem [resolvable:$false] %s1214_s19 }
  0x60   : > { %p1212_p13 = pnand %p1210_p1, %p1738_p11  ;;  %s1216_s25 = scalar_lea.vmem %s1215_s19, 224 }
  0x61   : > { %p1217_p10 = scmp.lt.s32.totalorder %s1480_s21, %s1215_s19  ;;  %p1218_p2 = scmp.lt.s32.totalorder %s1216_s25, %s1209_s11 }
  0x62   : > { %p1213_p0 = pneg %p1212_p13 }
  0x63   : > { %p1219_p6 = por %p1218_p2, %p1217_p10 }
  0x65   : > { %p1220_p4 = pnand %p1219_p6, %p1213_p0 }
  0x67   : > { %1223 = shalt.err (!%p1220_p4)
}
  0x68   : > { %1071 = dma.hbm_to_vmem [thread:$0]  (!%p1736_p8), %s1478_s26, 112, %s1480_s21, %s1405_s5  }
  0x69   : > { %p1739_p3 = scmp.ne.s32.totalorder %s1734_s9, 0 }
  0x6a   : > { %p1740_p7 = scmp.eq.s32.totalorder (!%p1739_p3), %s1434_s30, 0 }
  0x6b   : > { %211 = sbr.rel (%p1739_p3) target bundleno = 419 (0x1a3), region = 32 }
  0x72   : > { %1277 = dma.done.wait (%p1740_p7), [#allocation3], 16   ;;  %p1741_p9 = pmov %p1740_p7 }
  0x73   : > { %s217_s22 = sand.u32 1, %s1434_s30   ;;  %s1530_s27 = sand.u32 1, %s1294_s13  }
  0x74   : > { %1279 = vsyncadd (%p1741_p9), [#allocation3], 4294967280  ;;  %s1049_s29 = smul.u32 784, %s1530_s27  ;;  %s218_s1 = scalar_lea.sflag [#allocation6], %s217_s22 }
  0x75   : > { %p1742_p8 = scmp.ne.s32.totalorder %s1731_s7, 0 }
  0x76   : > { %s1533_s18 = scalar_lea.vmem [#allocation5], %s1049_s29 }
  0x77   : > { %1281 = dma.done.wait (%p1742_p8), %s218_s1, 12656  }
  0x78   : > { %1283 = vsyncadd (%p1742_p8), %s218_s1, 4294954640  ;;  %v1318_v0 = vmov 0.0   ;;  %v262_v1 = vld [vmem:[%s1533_s18 + $0x8] sm:$0xff]  ;;  %v269_v2 = vld [vmem:[%s1533_s18 + $0x40] sm:$0xff]  ;;  %vm397_vm0 = vcmask 916480   ;;  %vm1320_vm1 = vmmov 0  }
  0x79   : > { %465 = vmatprep.mubr.f32.mxu0 %v1318_v0  ;;  %536 = vmatprep.mubr.f32.mxu1 %v1318_v0  ;;  %v264_v3 = vld [vmem:[%s1533_s18 + $0x18] sm:$0xff]  ;;  %v942_v4 = vpack.c.bf16 %v269_v2, %v262_v1  ;;  %v271_v5 = vld [vmem:[%s1533_s18 + $0x50] sm:$0xff]  ;;  %v261_v6 = vld [vmem:[%s1533_s18] sm:$0xff]  ;;  %s1050_s5 = smul.u32 7, %s1530_s27  ;;  %s746_s23 = scalar_lea.sflag [#allocation4], %s1530_s27 }
  0x7a   : > { %v268_v7 = vld [vmem:[%s1533_s18 + $0x38] sm:$0xff]  ;;  %v970_v8 = vpack.c.bf16 %v271_v5, %v264_v3  ;;  %v263_v10 = vld [vmem:[%s1533_s18 + $0x10] sm:$0xff]  ;;  %v270_v11 = vld [vmem:[%s1533_s18 + $0x48] sm:$0xff]  ;;  %s895_s7 = smul.u32 112, %s1302_s15  ;;  %p1743_p5 = scmp.ne.s32.totalorder %s1732_s28, 0 }
  0x7b   : > { %v944_v9 = vpack.c.bf16 %v268_v7, %v261_v6  ;;  %v276_v12 = vld [vmem:[%s1533_s18 + $0x78] sm:$0xff]  ;;  %943 = vmatprep.subr.bf16.mxu0 %v942_v4  ;;  %v972_v13 = vpack.c.bf16 %v270_v11, %v263_v10  ;;  %v283_v14 = vld [vmem:[%s1533_s18 + $0xb0] sm:$0xff]  ;;  %v278_v15 = vld [vmem:[%s1533_s18 + $0x88] sm:$0xff]  ;;  %s230_s30 = scalar_lea.vmem [#allocation7], %s1050_s5  ;;  %s257_s9 = scalar_lea.vmem [#allocation8], %s1050_s5 }
  0x7c   : > { %v285_v16 = vld [vmem:[%s1533_s18 + $0xc0] sm:$0xff]  ;;  %971 = vmatprep.subr.bf16.mxu1 %v970_v8  ;;  %v946_v17 = vpack.c.bf16 %v283_v14, %v276_v12  ;;  %v275_v19 = vld [vmem:[%s1533_s18 + $0x70] sm:$0xff]  ;;  %v282_v20 = vld [vmem:[%s1533_s18 + $0xa8] sm:$0xff]  ;;  %s762_s21 = sshll.u32 %s257_s9, 4  ;;  %s1667_s10 = scalar_lea.hbm %s1718_s3, %s895_s7  ;;  %s1669_s21 = int_to_ptr.vmem [resolvable:$true] %s762_s21 }
  0x7d   : > { %945 = vmatpush1.bf16.msra.mxu0 %v944_v9  ;;  %v974_v18 = vpack.c.bf16 %v285_v16, %v278_v15  ;;  %v277_v21 = vld [vmem:[%s1533_s18 + $0x80] sm:$0xff]  ;;  %973 = vmatpush1.bf16.msra.mxu1 %v972_v13  ;;  %v948_v22 = vpack.c.bf16 %v282_v20, %v275_v19  ;;  %v284_v23 = vld [vmem:[%s1533_s18 + $0xb8] sm:$0xff]  ;;  %v290_v24 = vld [vmem:[%s1533_s18 + $0xe8] sm:$0xff]  ;;  %s1224_s15 = scalar_lea.vmem %s1669_s21, 112  ;;  %s1322_s8 = smov [#allocation8]  }
  0x7e   : > { %v297_v25 = vld [vmem:[%s1533_s18 + $0x120] sm:$0xff]  ;;  %947 = vmatprep.subr.bf16.mxu0 %v946_v17  ;;  %v976_v26 = vpack.c.bf16 %v284_v23, %v277_v21  ;;  %v292_v28 = vld [vmem:[%s1533_s18 + $0xf8] sm:$0xff]  ;;  %v299_v29 = vld [vmem:[%s1533_s18 + $0x130] sm:$0xff]  ;;  %p1225_p12 = scmp.ne.s32.totalorder %s1669_s21, %s1224_s15  ;;  %s1228_s11 = sshll.u32 %s1322_s8, 4  ;;  %s1229_s11 = int_to_ptr.vmem [resolvable:$false] %s1228_s11 }
  0x7f   : > { %975 = vmatprep.subr.bf16.mxu1 %v974_v18  ;;  %v950_v27 = vpack.c.bf16 %v297_v25, %v290_v24  ;;  %v289_v30 = vld [vmem:[%s1533_s18 + $0xe0] sm:$0xff]  ;;  %v978_v31 = vpack.c.bf16 %v299_v29, %v292_v28  ;;  %v296_v32 = vld [vmem:[%s1533_s18 + $0x118] sm:$0xff]  ;;  %v291_v33 = vld [vmem:[%s1533_s18 + $0xf0] sm:$0xff]  ;;  %s1230_s20 = scalar_lea.vmem %s1229_s11, 224  ;;  %p1231_p13 = scmp.lt.s32.totalorder %s1669_s21, %s1229_s11 }
  0x80   : > { %v298_v34 = vld [vmem:[%s1533_s18 + $0x128] sm:$0xff]  ;;  %v952_v35 = vpack.c.bf16 %v296_v32, %v289_v30  ;;  %v304_v36 = vld [vmem:[%s1533_s18 + $0x158] sm:$0xff]  ;;  %v311_v37 = vld [vmem:[%s1533_s18 + $0x190] sm:$0xff]  ;;  %p1226_p1 = pnand %p1225_p12, %p1743_p5  ;;  %p1232_p0 = scmp.lt.s32.totalorder %s1230_s20, %s1224_s15 }
  0x81   : > { %949 = vmatpush1.bf16.msra.mxu0 %v948_v22  ;;  %v306_v38 = vld [vmem:[%s1533_s18 + $0x168] sm:$0xff]  ;;  %977 = vmatpush1.bf16.msra.mxu1 %v976_v26  ;;  %v980_v39 = vpack.c.bf16 %v298_v34, %v291_v33  ;;  %v954_v40 = vpack.c.bf16 %v311_v37, %v304_v36  ;;  %v313_v41 = vld [vmem:[%s1533_s18 + $0x1a0] sm:$0xff]  ;;  %v303_v42 = vld [vmem:[%s1533_s18 + $0x150] sm:$0xff] }
  0x82   : > { %951 = vmatprep.subr.bf16.mxu0 %v950_v27  ;;  %v310_v43 = vld [vmem:[%s1533_s18 + $0x188] sm:$0xff]  ;;  %979 = vmatprep.subr.bf16.mxu1 %v978_v31  ;;  %v982_v44 = vpack.c.bf16 %v313_v41, %v306_v38  ;;  %v305_v45 = vld [vmem:[%s1533_s18 + $0x160] sm:$0xff]  ;;  %v312_v46 = vld [vmem:[%s1533_s18 + $0x198] sm:$0xff]  ;;  %v1319_v38 = vmov 0.0|0.0   ;;  %p1227_p11 = pneg %p1226_p1  ;;  %p1233_p10 = por %p1232_p0, %p1231_p13 }
  0x83   : > { %v318_v47 = vld [vmem:[%s1533_s18 + $0x1c8] sm:$0xff]  ;;  %v325_v48 = vld [vmem:[%s1533_s18 + $0x200] sm:$0xff]  ;;  %v320_v49 = vld [vmem:[%s1533_s18 + $0x1d8] sm:$0xff]  ;;  %v956_v51 = vpack.c.bf16 %v310_v43, %v303_v42  ;;  %v984_v52 = vpack.c.bf16 %v312_v46, %v305_v45 }
  0x84   : > { %v327_v50 = vld [vmem:[%s1533_s18 + $0x210] sm:$0xff]  ;;  %v958_v53 = vpack.c.bf16 %v325_v48, %v318_v47  ;;  %v317_v54 = vld [vmem:[%s1533_s18 + $0x1c0] sm:$0xff]  ;;  %v324_v55 = vld [vmem:[%s1533_s18 + $0x1f8] sm:$0xff]  ;;  %p1234_p2 = pnand %p1233_p10, %p1227_p11 }
  0x85   : > { %953 = vmatpush1.bf16.msra.mxu0 %v952_v35  ;;  %981 = vmatpush1.bf16.msra.mxu1 %v980_v39  ;;  %v319_v56 = vld [vmem:[%s1533_s18 + $0x1d0] sm:$0xff]  ;;  %v986_v57 = vpack.c.bf16 %v327_v50, %v320_v49  ;;  %v326_v58 = vld [vmem:[%s1533_s18 + $0x208] sm:$0xff]  ;;  %v332_v59 = vld [vmem:[%s1533_s18 + $0x238] sm:$0xff]  ;;  %v960_v63 = vpack.c.bf16 %v324_v55, %v317_v54 }
  0x86   : > { %955 = vmatprep.subr.bf16.mxu0 %v954_v40  ;;  %983 = vmatprep.subr.bf16.mxu1 %v982_v44  ;;  %v339_v60 = vld [vmem:[%s1533_s18 + $0x270] sm:$0xff]  ;;  %v334_v61 = vld [vmem:[%s1533_s18 + $0x248] sm:$0xff]  ;;  %v341_v62 = vld [vmem:[%s1533_s18 + $0x280] sm:$0xff]  ;;  %v988_v1 = vpack.c.bf16 %v326_v58, %v319_v56 }
  0x87   : > { %v962_v2 = vpack.c.bf16 %v339_v60, %v332_v59  ;;  %v331_v3 = vld [vmem:[%s1533_s18 + $0x230] sm:$0xff]  ;;  %v338_v4 = vld [vmem:[%s1533_s18 + $0x268] sm:$0xff]  ;;  %v333_v5 = vld [vmem:[%s1533_s18 + $0x240] sm:$0xff]  ;;  %v990_v6 = vpack.c.bf16 %v341_v62, %v334_v61 }
  0x88   : > { %v340_v7 = vld [vmem:[%s1533_s18 + $0x278] sm:$0xff]  ;;  %v346_v8 = vld [vmem:[%s1533_s18 + $0x2a8] sm:$0xff]  ;;  %v353_v9 = vld [vmem:[%s1533_s18 + $0x2e0] sm:$0xff]  ;;  %v964_v12 = vpack.c.bf16 %v338_v4, %v331_v3 }
  0x89   : > { %957 = vmatpush1.bf16.msra.mxu0 %v956_v51  ;;  %985 = vmatpush1.bf16.msra.mxu1 %v984_v52  ;;  %v348_v10 = vld [vmem:[%s1533_s18 + $0x2b8] sm:$0xff]  ;;  %v355_v11 = vld [vmem:[%s1533_s18 + $0x2f0] sm:$0xff]  ;;  %v992_v13 = vpack.c.bf16 %v340_v7, %v333_v5  ;;  %v966_v14 = vpack.c.bf16 %v353_v9, %v346_v8  ;;  %v345_v15 = vld [vmem:[%s1533_s18 + $0x2a0] sm:$0xff] }
  0x8a   : > { %959 = vmatprep.subr.bf16.mxu0 %v958_v53  ;;  %987 = vmatprep.subr.bf16.mxu1 %v986_v57  ;;  %v352_v16 = vld [vmem:[%s1533_s18 + $0x2d8] sm:$0xff]  ;;  %v347_v17 = vld [vmem:[%s1533_s18 + $0x2b0] sm:$0xff]  ;;  %v994_v18 = vpack.c.bf16 %v355_v11, %v348_v10  ;;  %v354_v19 = vld [vmem:[%s1533_s18 + $0x2e8] sm:$0xff] }
  0x8b   : > { %v266_v20 = vld [vmem:[%s1533_s18 + $0x28] sm:$0xff]  ;;  %v273_v21 = vld [vmem:[%s1533_s18 + $0x60] sm:$0xff]  ;;  %v968_v22 = vpack.c.bf16 %v352_v16, %v345_v15  ;;  %v996_v23 = vpack.c.bf16 %v354_v19, %v347_v17  ;;  %v272_v26 = vld [vmem:[%s1533_s18 + $0x58] sm:$0xff] }
  0x8c   : > { %v998_v24 = vpack.c.bf16 %v273_v21, %v266_v20  ;;  %v265_v25 = vld [vmem:[%s1533_s18 + $0x20] sm:$0xff]  ;;  %v267_v27 = vld [vmem:[%s1533_s18 + $0x30] sm:$0xff]  ;;  %v274_v28 = vld [vmem:[%s1533_s18 + $0x68] sm:$0xff] }
  0x8d   : > { %961 = vmatpush1.bf16.msra.mxu0 %v960_v63  ;;  %989 = vmatpush1.bf16.msra.mxu1 %v988_v1  ;;  %v280_v29 = vld [vmem:[%s1533_s18 + $0x98] sm:$0xff]  ;;  %v287_v30 = vld [vmem:[%s1533_s18 + $0xd0] sm:$0xff]  ;;  %v1000_v32 = vpack.c.bf16 %v272_v26, %v265_v25  ;;  %v1027_v33 = vpack.c.bf16 %v274_v28, %v267_v27  ;;  %v286_v36 = vld [vmem:[%s1533_s18 + $0xc8] sm:$0xff] }
  0x8e   : > { %963 = vmatprep.subr.bf16.mxu0 %v962_v2  ;;  %991 = vmatprep.subr.bf16.mxu1 %v990_v6  ;;  %v1605_v31 = vld [vmem:[#allocation2] sm:$0x1]  ;;  %v1002_v34 = vpack.c.bf16 %v287_v30, %v280_v29  ;;  %v279_v35 = vld [vmem:[%s1533_s18 + $0x90] sm:$0xff]  ;;  %v281_v37 = vld [vmem:[%s1533_s18 + $0xa0] sm:$0xff]  ;;  %v1321_v29 = vmov 1966171168  }
  0x8f   : > { %v288_v39 = vld [vmem:[%s1533_s18 + $0xd8] sm:$0xff]  ;;  %v294_v40 = vld [vmem:[%s1533_s18 + $0x108] sm:$0xff]  ;;  %v301_v41 = vld [vmem:[%s1533_s18 + $0x140] sm:$0xff]  ;;  %v1004_v42 = vpack.c.bf16 %v286_v36, %v279_v35  ;;  %v695_v30 = vunpack.c.l.s4 %v1321_v29 }
  0x90   : > { %v1030_v43 = vpack.c.bf16 %v288_v39, %v281_v37  ;;  %v1006_v44 = vpack.c.bf16 %v301_v41, %v294_v40  ;;  %v293_v45 = vld [vmem:[%s1533_s18 + $0x100] sm:$0xff]  ;;  %v300_v46 = vld [vmem:[%s1533_s18 + $0x138] sm:$0xff]  ;;  %v295_v47 = vld [vmem:[%s1533_s18 + $0x110] sm:$0xff] }
  0x91   : > { %965 = vmatpush1.bf16.msra.mxu0 %v964_v12  ;;  %993 = vmatpush1.bf16.msra.mxu1 %v992_v13  ;;  %v302_v48 = vld [vmem:[%s1533_s18 + $0x148] sm:$0xff]  ;;  %v308_v49 = vld [vmem:[%s1533_s18 + $0x178] sm:$0xff]  ;;  %v315_v50 = vld [vmem:[%s1533_s18 + $0x1b0] sm:$0xff]  ;;  %v1008_v51 = vpack.c.bf16 %v300_v46, %v293_v45  ;;  %v696_v36 = vunpack.c.0.s8 %v695_v30 }
  0x92   : > { %967 = vmatprep.subr.bf16.mxu0 %v966_v14  ;;  %995 = vmatprep.subr.bf16.mxu1 %v994_v18  ;;  %v1033_v52 = vpack.c.bf16 %v302_v48, %v295_v47  ;;  %v1010_v53 = vpack.c.bf16 %v315_v50, %v308_v49  ;;  %v307_v54 = vld [vmem:[%s1533_s18 + $0x170] sm:$0xff]  ;;  %v314_v55 = vld [vmem:[%s1533_s18 + $0x1a8] sm:$0xff]  ;;  %v309_v56 = vld [vmem:[%s1533_s18 + $0x180] sm:$0xff] }
  0x93   : > { %v316_v57 = vld [vmem:[%s1533_s18 + $0x1b8] sm:$0xff]  ;;  %v322_v58 = vld [vmem:[%s1533_s18 + $0x1e8] sm:$0xff]  ;;  %v1012_v59 = vpack.c.bf16 %v314_v55, %v307_v54  ;;  %v321_v62 = vld [vmem:[%s1533_s18 + $0x1e0] sm:$0xff] }
  0x94   : > { %v1036_v60 = vpack.c.bf16 %v316_v57, %v309_v56  ;;  %v328_v63 = vld [vmem:[%s1533_s18 + $0x218] sm:$0xff]  ;;  %v323_v1 = vld [vmem:[%s1533_s18 + $0x1f0] sm:$0xff]  ;;  %v330_v2 = vld [vmem:[%s1533_s18 + $0x228] sm:$0xff] }
  0x95   : > { %969 = vmatpush1.bf16.msra.mxu0 %v968_v22  ;;  %997 = vmatpush1.bf16.msra.mxu1 %v996_v23  ;;  %v336_v3 = vld [vmem:[%s1533_s18 + $0x258] sm:$0xff]  ;;  %v343_v4 = vld [vmem:[%s1533_s18 + $0x290] sm:$0xff]  ;;  %v1016_v5 = vpack.c.bf16 %v328_v63, %v321_v62  ;;  %v1039_v6 = vpack.c.bf16 %v330_v2, %v323_v1  ;;  %v342_v9 = vld [vmem:[%s1533_s18 + $0x288] sm:$0xff]  ;;  %v362_v23 = vlaneseq }
  0x96   : > { %999 = vmatprep.subr.bf16.mxu0 %v998_v24  ;;  %1026 = vmatprep.subr.bf16.mxu1 %v1319_v38  ;;  %v1018_v7 = vpack.c.bf16 %v343_v4, %v336_v3  ;;  %v335_v8 = vld [vmem:[%s1533_s18 + $0x250] sm:$0xff]  ;;  %v337_v10 = vld [vmem:[%s1533_s18 + $0x260] sm:$0xff]  ;;  %v344_v11 = vld [vmem:[%s1533_s18 + $0x298] sm:$0xff] }
  0x97   : > { %v350_v12 = vld [vmem:[%s1533_s18 + $0x2c8] sm:$0xff]  ;;  %v357_v13 = vld [vmem:[%s1533_s18 + $0x300] sm:$0xff]  ;;  %v1020_v14 = vpack.c.bf16 %v342_v9, %v335_v8  ;;  %v1042_v15 = vpack.c.bf16 %v344_v11, %v337_v10  ;;  %v356_v18 = vld [vmem:[%s1533_s18 + $0x2f8] sm:$0xff]  ;;  %v363_v24 = vshrl.u32 %v362_v23, 7  ;;  %vm742_vm2 = vcmp.lt.s32.totalorder %v362_v23, 896 }
  0x98   : > { %886 = vmatmul.mubr.msk.f32.vlgmr.msra.gmra.mrb[0].mxu0 %vm397_vm0, %v1605_v31  ;;  %887 = vmatmul.mubr.msk.f32.vlgmr.msra.gmra.mrb[0].mxu1 %vm397_vm0, %v1605_v31  ;;  %v1022_v16 = vpack.c.bf16 %v357_v13, %v350_v12  ;;  %v349_v17 = vld [vmem:[%s1533_s18 + $0x2c0] sm:$0xff]  ;;  %v351_v19 = vld [vmem:[%s1533_s18 + $0x2d0] sm:$0xff]  ;;  %v358_v20 = vld [vmem:[%s1533_s18 + $0x308] sm:$0xff] }
  0x99   : > { %1001 = vmatpush1.bf16.msra.mxu0 %v1000_v32  ;;  %1028 = vmatpush3.bf16.msra.mxu1 %v1027_v33  ;;  %v1024_v21 = vpack.c.bf16 %v356_v18, %v349_v17  ;;  %v1045_v22 = vpack.c.bf16 %v358_v20, %v351_v19  ;;  %v364_v25 = vsub.s32 0, %v363_v24  ;;  %v360_v26 = vld [vmem:[%s230_s30] sm:$0xff]  ;;  %v372_v27 = vsub.s32 2, %v363_v24 }
  0x9a   : > { %1003 = vmatprep.subr.bf16.mxu0 %v1002_v34  ;;  %1029 = vmatprep.subr.bf16.mxu1 %v1319_v38  ;;  %v368_v28 = vsub.s32 1, %v363_v24  ;;  %v376_v32 = vsub.s32 3, %v363_v24 }
  0x9b   : > { %607 = vmatprep.mubr.f32.mxu0 %v1318_v0  ;;  %939 = vmatprep.mubr.msk.f32.mxu1 %vm1320_vm1, %v1318_v0  ;;  %v329_v0 = vld [vmem:[%s1533_s18 + $0x220] sm:$0xff]  ;;  %v365_v33 = vrot.slane %v360_v26, %v364_v25  ;;  %v373_v34 = vrot.slane %v360_v26, %v372_v27 }
  0x9c   : > { %v1014_v61 = vpack.c.bf16 %v329_v0, %v322_v58  ;;  %v369_v35 = vrot.slane %v360_v26, %v368_v28  ;;  %v377_v37 = vrot.slane %v360_v26, %v376_v32 }
  0x9d   : > { %1005 = vmatpush1.bf16.msra.mxu0 %v1004_v42  ;;  %1031 = vmatpush3.bf16.msra.mxu1 %v1030_v43  ;;  %v699_v43 = vsub.s32 %v696_v36, %v363_v24 }
  0x9e   : > { %1007 = vmatprep.subr.bf16.mxu0 %v1006_v44  ;;  %1032 = vmatprep.subr.bf16.mxu1 %v1319_v38 }
  0xa1   : > { %1009 = vmatpush1.bf16.msra.mxu0 %v1008_v51  ;;  %1034 = vmatpush3.bf16.msra.mxu1 %v1033_v52  ;;  %v380_v51 = vsub.s32 4, %v363_v24  ;;  %v384_v52 = vsub.s32 5, %v363_v24 }
  0xa2   : > { %1011 = vmatprep.subr.bf16.mxu0 %v1010_v53  ;;  %1035 = vmatprep.subr.bf16.mxu1 %v1319_v38  ;;  %v388_v53 = vsub.s32 6, %v363_v24 }
  0xa3   : > { %v381_v54 = vrot.slane %v360_v26, %v380_v51  ;;  %v385_v55 = vrot.slane %v360_v26, %v384_v52 }
  0xa4   : > { %v389_v56 = vrot.slane %v360_v26, %v388_v53 }
  0xa5   : > { %1013 = vmatpush1.bf16.msra.mxu0 %v1012_v59  ;;  %1037 = vmatpush3.bf16.msra.mxu1 %v1036_v60 }
  0xa6   : > { %1015 = vmatprep.subr.bf16.mxu0 %v1014_v61  ;;  %1038 = vmatprep.subr.bf16.mxu1 %v1319_v38 }
  0xa9   : > { %1017 = vmatpush1.bf16.msra.mxu0 %v1016_v5  ;;  %1040 = vmatpush3.bf16.msra.mxu1 %v1039_v6 }
  0xaa   : > { %1019 = vmatprep.subr.bf16.mxu0 %v1018_v7  ;;  %1041 = vmatprep.subr.bf16.mxu1 %v1319_v38 }
  0xad   : > { %1021 = vmatpush1.bf16.msra.mxu0 %v1020_v14  ;;  %1043 = vmatpush3.bf16.msra.mxu1 %v1042_v15 }
  0xae   : > { %1023 = vmatprep.subr.bf16.mxu0 %v1022_v16  ;;  %1044 = vmatprep.subr.bf16.mxu1 %v1319_v38 }
  0xb1   : > { %1025 = vmatpush1.bf16.msra.mxu0 %v1024_v21  ;;  %1046 = vmatpush3.bf16.msra.mxu1 %v1045_v22 }
  0xb4   : > { %888 = vmatmul.mubr.msk.f32.vlgmr.msra.gmra.mrb[2].mxu0 %vm397_vm0, %v1605_v31  ;;  %940 = vmatmul.mubr.msk.f32.vlgmr.msra.gmra.mrb[2].mxu1 %vm397_vm0, %v1605_v31 }
 0x16b   : > { %v467_v38 = vpop.f32.mrb[0].mxu0  ;;  %v538_v31 = vpop.f32.mrb[0].mxu1 }
 0x16c   : > { %v468_v39 = vadd.f32 %v467_v38, %v365_v33  ;;  %v469_v40 = vpop.f32.mrb[1].mxu0  ;;  %v539_v41 = vadd.f32 %v538_v31, %v373_v34  ;;  %v540_v44 = vpop.f32.mrb[1].mxu1 }
 0x16d   : > { %v470_v42 = vadd.f32 %v469_v40, %v369_v35  ;;  %v541_v45 = vadd.f32 %v540_v44, %v377_v37 }
 0x16f   : > { %v691_v46 = vcombine.low %v468_v39, %v470_v42  ;;  %v692_v47 = vcombine.low %v539_v41, %v541_v45 }
 0x171   : > { %v700_v48 = vrot.slane %v691_v46, %v699_v43  ;;  %v707_v49 = vrot.slane %v692_v47, %v699_v43 }
 0x173   : > { %v722_v50 = vcombine.low %v700_v48, %v707_v49 }
 0x175   : > { %v730_v4 = vrot.slane %v722_v50, %v699_v43 }
 0x187   : > { %v609_v57 = vpop.f32.mrb[2].mxu0  ;;  %v680_v59 = vpop.f32.mrb[2].mxu1 }
 0x188   : > { %v610_v58 = vadd.f32 %v609_v57, %v381_v54  ;;  %v611_v0 = vpop.f32.mrb[3].mxu0  ;;  %v681_v61 = vadd.f32 %v680_v59, %v389_v56  ;;  %v941_v62 = vpop.f32.mrb[3].mxu1 }
 0x189   : > { %v612_v60 = vadd.f32 %v611_v0, %v385_v55 }
 0x18a   : > { %v721_v1 = vrot.slane %v681_v61, %v699_v43 }
 0x18b   : > { %v693_v63 = vcombine.low %v610_v58, %v612_v60 }
 0x18d   : > { %v714_v2 = vrot.slane %v693_v63, %v699_v43 }
 0x18f   : > { %v723_v3 = vcombine.low %v714_v2, %v721_v1 }
 0x191   : > { %v737_v5 = vrot.slane %v723_v3, %v699_v43 }
 0x193   : > { %v738_v6 = vcombine.low %v730_v4, %v737_v5 }
 0x195   : > { %744 = vst.msk [vmem:[%s257_s9] sm:$0x7f] %vm742_vm2, %v738_v6 }
 0x196   : > { %1237 = shalt.err (!%p1234_p2)
}
 0x197   : > { %s1238_s19 = scalar_lea.hbm %s1667_s10, 112  ;;  %s1242_s27 = scalar_lea.hbm %s1718_s3, 336 }
 0x198   : > { %p1239_p6 = scmp.ne.s32.totalorder %s1667_s10, %s1238_s19  ;;  %p1243_p7 = scmp.lt.u32.totalorder %s1667_s10, %s1718_s3 }
 0x199   : > { %p1244_p9 = scmp.lt.u32.totalorder %s1242_s27, %s1238_s19  ;;  %p1246_p12 = scmp.lt.u32.totalorder %s1238_s19, %s1667_s10 }
 0x19a   : > { %p1240_p4 = pnand %p1239_p6, %p1743_p5 }
 0x19b   : > { %p1245_p8 = por %p1244_p9, %p1243_p7 }
 0x19c   : > { %p1241_p3 = pneg %p1240_p4 }
 0x19d   : > { %p1247_p1 = por %p1246_p12, %p1245_p8 }
 0x19f   : > { %p1248_p11 = pnand %p1247_p1, %p1241_p3 }
 0x1a1   : > { %1251 = shalt.err (!%p1248_p11)
}
 0x1a2   : > { %1059 = dma.vmem_to_hbm [thread:$0]  (%p1743_p5), %s1669_s21, 112, %s1667_s10, %s746_s23  }
 0x1a3 PF: > { %p1079_p13 = scmp.ge.s32.totalorder %s1310_s17, 2  ;;  %s774_s18 = sand.u32 1, %s1290_s12  }
 0x1a4   : > { %p1744_p0 = scmp.ne.s32.totalorder %s1733_s4, 0  ;;  %s775_s5 = scalar_lea.sflag [#allocation4], %s774_s18 }
 0x1a6   : > { %p1073_p10 = pnand %p1079_p13, %p1744_p0 }
 0x1a8   : > { %1285 = dma.done.wait (!%p1073_p10), %s775_s5, 112  }
 0x1a9   : > { %1287 = vsyncadd (!%p1073_p10), %s775_s5, 4294967184  ;;  %s20_s17 = sadd.s32 1, %s1310_s17   ;;  %s1745_s28 = sld [smem:[#allocation12_spill]] }
 0x1aa   : > { %p17_p2 = scmp.ge.s32.totalorder %s20_s17, 5   ;;  %s1746_s12 = smov %s1294_s13 }
 0x1ab   : > { %s1747_s13 = smov %s1298_s14  ;;  %s1748_s14 = smov %s1390_s24 }
 0x1ac   : > { %s1749_s15 = smov %s1306_s16  ;;  %19 = sbr.rel (!%p17_p2) target bundleno = 9 (0x9), region = 94 }
 0x1af   : > { %s1750_s16 = smov %s1745_s28 }
 0x1b3   :  { %780 = vsyncpa [#allocation3], 1 }
 0x1b4   :  { %782 = vsyncpa [#allocation3 + $0x1], 1 }
 0x1b5   :  { %783 = vsyncpa [#allocation6], 1 }
 0x1b6   :  { %785 = vsyncpa [#allocation6 + $0x1], 1 }
 0x1b7   :  { %786 = vsyncpa [#allocation4], 1 }
 0x1b8   :  { %788 = vsyncpa [#allocation4 + $0x1], 1 }

</bundles_post_ra>
